<compile_context>
chip_gen: v6e
topology: v6e:2x2x1
jax: 0.10.0
libtpu: 0.0.40
codegen_flags: <defaults>
</compile_context>

<pallas_src>
import jax
import jax.numpy as jnp
from jax.experimental import pallas as pl
from jax.experimental.pallas import tpu as pltpu

EPS = 1e-5
NEG_SLOPE = 0.01  # F.leaky_relu default

# Row offsets inside the packed (80, 128) parameter slab (each segment starts
# on an 8-row boundary so all in-kernel slices are sublane-aligned).
_W1_R, _B1_R, _W2_R, _B2_R, _W3_R, _B3_R = 0, 16, 24, 56, 64, 72
_P_ROWS, _P_COLS = 80, 128


def _leaky_relu(x):
    return jnp.where(x >= 0, x, NEG_SLOPE * x)


def mlp_kernel(x_ref, p_ref, out_ref):
    x = x_ref[...]                      # (B, 15) f32
    inv_b = 1.0 / x.shape[0]

    def bn_norm(h):
        # one-pass batch stats: biased variance, eps = 1e-5 (PyTorch BN)
        s = jnp.sum(h, axis=0, keepdims=True)
        sq = jnp.sum(h * h, axis=0, keepdims=True)
        mean = s * inv_b
        var = sq * inv_b - mean * mean
        return (h - mean) * jax.lax.rsqrt(var + EPS)

    # static slices of the packed parameter slab (BN affine already folded in)
    w1 = p_ref[_W1_R:_W1_R + 15, 0:32]          # (15, 32)
    b1 = p_ref[_B1_R:_B1_R + 1, 0:32]           # (1, 32)
    w2 = p_ref[_W2_R:_W2_R + 32, 0:16]          # (32, 16)
    b2 = p_ref[_B2_R:_B2_R + 1, 0:16]           # (1, 16)
    w3r = p_ref[_W3_R:_W3_R + 1, 0:16]          # (1, 16)  fc3 weight as a row
    b3 = p_ref[_B3_R:_B3_R + 1, 0:1]            # (1, 1)

    # bn1 + fc1 + leaky_relu   (dropout = identity in eval mode)
    h = bn_norm(x)
    h = jnp.dot(h, w1, preferred_element_type=jnp.float32) + b1
    h = _leaky_relu(h)

    # bn2 + fc2 + leaky_relu
    h = bn_norm(h)
    x2 = jnp.dot(h, w2, preferred_element_type=jnp.float32) + b2
    x2 = _leaky_relu(x2)                         # (B, 16)

    # bn3 + fc3 (16x1 projection done on the VPU: multiply + lane reduction)
    h = bn_norm(x2)
    y3 = jnp.sum(h * w3r, axis=-1, keepdims=True) + b3   # (B, 1)

    # single lane-dense output slab: [0:16] = leaky_relu(fc2), [16:17] = fc3
    out_ref[...] = jnp.zeros_like(out_ref)
    out_ref[:, 0:16] = x2
    out_ref[:, 16:17] = y3


def pack_params(params):
    """Fold BN affine into the linears and pack everything into one slab."""
    (g1, be1, w1, b1, g2, be2, w2, b2, g3, be3, w3, b3) = params
    w1f = g1.reshape(-1, 1) * w1
    b1f = be1 @ w1 + b1
    w2f = g2.reshape(-1, 1) * w2
    b2f = be2 @ w2 + b2
    w3f = g3.reshape(-1, 1) * w3
    b3f = be3 @ w3 + b3

    P = jnp.zeros((_P_ROWS, _P_COLS), jnp.float32)
    P = P.at[_W1_R:_W1_R + 15, 0:32].set(w1f)
    P = P.at[_B1_R:_B1_R + 1, 0:32].set(b1f)
    P = P.at[_W2_R:_W2_R + 32, 0:16].set(w2f)
    P = P.at[_B2_R:_B2_R + 1, 0:16].set(b2f)
    P = P.at[_W3_R:_W3_R + 1, 0:16].set(w3f.T)
    P = P.at[_B3_R:_B3_R + 1, 0:1].set(b3f)
    return P


def model_forward(x, params):
    B = x.shape[0]
    packed = pack_params(params)
    vspec = pl.BlockSpec(memory_space=pltpu.MemorySpace.VMEM)

    flops = 2 * B * (15 * 32 + 32 * 16 + 16 * 1) + 10 * B * (15 + 32 + 16)
    bytes_accessed = (x.size + packed.size + B * _P_COLS) * 4

    slab = pl.pallas_call(
        mlp_kernel,
        out_shape=jax.ShapeDtypeStruct((B, _P_COLS), jnp.float32),
        in_specs=[vspec, vspec],
        out_specs=vspec,
        cost_estimate=pl.CostEstimate(
            flops=flops, transcendentals=3 * 64, bytes_accessed=bytes_accessed),
    )(x, packed)

    out = slab[:, 16:17]    # fc3 output      (B, 1)
    x2 = slab[:, 0:16]      # leaky_relu(fc2) (B, 16)
    return out, x2


def init_params(key):
    n_in, n_hid, n_mid, n_out = 15, 32, 16, 1
    ks = jax.random.split(key, 6)

    def xavier_normal(k, fan_in, fan_out):
        std = (2.0 / (fan_in + fan_out)) ** 0.5
        # stored as (in, out) so the kernel computes x @ W
        return jax.random.normal(k, (fan_in, fan_out), jnp.float32) * std

    def linear_bias(k, fan_in, n):
        bound = 1.0 / (fan_in ** 0.5)
        return jax.random.uniform(k, (1, n), jnp.float32, -bound, bound)

    # BatchNorm affine params at PyTorch init: gamma=1, beta=0
    g1 = jnp.ones((1, n_in), jnp.float32);  be1 = jnp.zeros((1, n_in), jnp.float32)
    g2 = jnp.ones((1, n_hid), jnp.float32); be2 = jnp.zeros((1, n_hid), jnp.float32)
    g3 = jnp.ones((1, n_mid), jnp.float32); be3 = jnp.zeros((1, n_mid), jnp.float32)

    w1 = xavier_normal(ks[0], n_in, n_hid);  b1 = linear_bias(ks[1], n_in, n_hid)
    w2 = xavier_normal(ks[2], n_hid, n_mid); b2 = linear_bias(ks[3], n_hid, n_mid)
    w3 = xavier_normal(ks[4], n_mid, n_out); b3 = linear_bias(ks[5], n_mid, n_out)

    return (g1, be1, w1, b1,
            g2, be2, w2, b2,
            g3, be3, w3, b3)


def reference_forward(x, params):
    """Pure-JAX reference with the original (unfolded) module semantics."""
    (g1, be1, w1, b1, g2, be2, w2, b2, g3, be3, w3, b3) = params

    def bn(h, g, be):
        mean = jnp.mean(h, axis=0, keepdims=True)
        var = jnp.mean((h - mean) ** 2, axis=0, keepdims=True)
        return (h - mean) * jax.lax.rsqrt(var + EPS) * g + be

    h = bn(x, g1, be1)
    h = _leaky_relu(h @ w1 + b1)
    h = bn(h, g2, be2)
    x_ = _leaky_relu(h @ w2 + b2)
    h = bn(x_, g3, be3)
    return h @ w3 + b3, x_


if __name__ == "__main__":
    key = jax.random.PRNGKey(0)
    kp, kx = jax.random.split(key)
    params = init_params(kp)

    B = 8  # small batch; features per the module: 15 -> 32 -> 16 -> 1
    x = jax.random.normal(kx, (B, 15), jnp.float32)

    out, x2 = model_forward(x, params)
    out, x2 = jax.block_until_ready((out, x2))

    ref_out, ref_x2 = reference_forward(x, params)
    assert out.shape == (B, 1) and x2.shape == (B, 16)
    assert jnp.allclose(out, ref_out, atol=1e-4, rtol=1e-4)
    assert jnp.allclose(x2, ref_x2, atol=1e-4, rtol=1e-4)

    print("KERNEL_OK")
</pallas_src>

<mosaic_0001>
module attributes {stable_mosaic.version = 11 : i64} {
  func.func @mlp_kernel(%arg0: memref<8x15xf32, #tpu.memory_space<vmem>>, %arg1: memref<80x128xf32, #tpu.memory_space<vmem>>, %arg2: memref<8x128xf32, #tpu.memory_space<vmem>>) attributes {dimension_semantics = [], scalar_prefetch = 0 : i64, scratch_operands = 0 : i64, tpu.core_type = #tpu.core_type<tc>} {
    %c0 = arith.constant 0 : index
    %c0_0 = arith.constant 0 : index
    %0 = vector.load %arg0[%c0, %c0_0] : memref<8x15xf32, #tpu.memory_space<vmem>>, vector<8x15xf32>
    %c0_1 = arith.constant 0 : index
    %c0_2 = arith.constant 0 : index
    %1 = vector.load %arg1[%c0_1, %c0_2] : memref<80x128xf32, #tpu.memory_space<vmem>>, vector<15x32xf32>
    %c16 = arith.constant 16 : index
    %c0_3 = arith.constant 0 : index
    %2 = vector.load %arg1[%c16, %c0_3] : memref<80x128xf32, #tpu.memory_space<vmem>>, vector<1x32xf32>
    %c24 = arith.constant 24 : index
    %c0_4 = arith.constant 0 : index
    %3 = vector.load %arg1[%c24, %c0_4] : memref<80x128xf32, #tpu.memory_space<vmem>>, vector<32x16xf32>
    %c56 = arith.constant 56 : index
    %c0_5 = arith.constant 0 : index
    %4 = vector.load %arg1[%c56, %c0_5] : memref<80x128xf32, #tpu.memory_space<vmem>>, vector<1x16xf32>
    %c64 = arith.constant 64 : index
    %c0_6 = arith.constant 0 : index
    %5 = vector.load %arg1[%c64, %c0_6] : memref<80x128xf32, #tpu.memory_space<vmem>>, vector<1x16xf32>
    %c72 = arith.constant 72 : index
    %c0_7 = arith.constant 0 : index
    %6 = vector.load %arg1[%c72, %c0_7] : memref<80x128xf32, #tpu.memory_space<vmem>>, vector<1x1xf32>
    %cst = arith.constant dense<0.000000e+00> : vector<15xf32>
    %7 = vector.multi_reduction <add>, %0, %cst [0] : vector<8x15xf32> to vector<15xf32>
    %8 = vector.shape_cast %7 : vector<15xf32> to vector<1x15xf32>
    %9 = arith.mulf %0, %0 : vector<8x15xf32>
    %cst_8 = arith.constant dense<0.000000e+00> : vector<15xf32>
    %10 = vector.multi_reduction <add>, %9, %cst_8 [0] : vector<8x15xf32> to vector<15xf32>
    %11 = vector.shape_cast %10 : vector<15xf32> to vector<1x15xf32>
    %cst_9 = arith.constant 1.250000e-01 : f32
    %12 = vector.broadcast %cst_9 : f32 to vector<1x15xf32>
    %13 = arith.mulf %8, %12 : vector<1x15xf32>
    %cst_10 = arith.constant 1.250000e-01 : f32
    %14 = vector.broadcast %cst_10 : f32 to vector<1x15xf32>
    %15 = arith.mulf %11, %14 : vector<1x15xf32>
    %16 = arith.mulf %13, %13 : vector<1x15xf32>
    %17 = arith.subf %15, %16 : vector<1x15xf32>
    %18 = vector.broadcast %13 : vector<1x15xf32> to vector<8x15xf32>
    %19 = arith.subf %0, %18 : vector<8x15xf32>
    %cst_11 = arith.constant 9.99999974E-6 : f32
    %20 = vector.broadcast %cst_11 : f32 to vector<1x15xf32>
    %21 = arith.addf %17, %20 : vector<1x15xf32>
    %22 = math.rsqrt %21 : vector<1x15xf32>
    %23 = vector.broadcast %22 : vector<1x15xf32> to vector<8x15xf32>
    %24 = arith.mulf %19, %23 : vector<8x15xf32>
    %cst_12 = arith.constant dense<0.000000e+00> : vector<8x32xf32>
    %25 = tpu.matmul %24, %1, %cst_12 {dimension_numbers = #tpu.dot_dimension_numbers<[1], [0], [0], [1], [0, 0, 1, 1], [], []>} : vector<8x15xf32>, vector<15x32xf32>, vector<8x32xf32> -> vector<8x32xf32>
    %26 = vector.broadcast %2 : vector<1x32xf32> to vector<8x32xf32>
    %27 = arith.addf %25, %26 : vector<8x32xf32>
    %cst_13 = arith.constant 0.000000e+00 : f32
    %28 = vector.broadcast %cst_13 : f32 to vector<8x32xf32>
    %29 = arith.cmpf oge, %27, %28 : vector<8x32xf32>
    %cst_14 = arith.constant 0.00999999977 : f32
    %30 = vector.broadcast %cst_14 : f32 to vector<8x32xf32>
    %31 = arith.mulf %30, %27 : vector<8x32xf32>
    %32 = arith.select %29, %27, %31 : vector<8x32xi1>, vector<8x32xf32>
    %cst_15 = arith.constant dense<0.000000e+00> : vector<32xf32>
    %33 = vector.multi_reduction <add>, %32, %cst_15 [0] : vector<8x32xf32> to vector<32xf32>
    %34 = vector.shape_cast %33 : vector<32xf32> to vector<1x32xf32>
    %35 = arith.mulf %32, %32 : vector<8x32xf32>
    %cst_16 = arith.constant dense<0.000000e+00> : vector<32xf32>
    %36 = vector.multi_reduction <add>, %35, %cst_16 [0] : vector<8x32xf32> to vector<32xf32>
    %37 = vector.shape_cast %36 : vector<32xf32> to vector<1x32xf32>
    %cst_17 = arith.constant 1.250000e-01 : f32
    %38 = vector.broadcast %cst_17 : f32 to vector<1x32xf32>
    %39 = arith.mulf %34, %38 : vector<1x32xf32>
    %cst_18 = arith.constant 1.250000e-01 : f32
    %40 = vector.broadcast %cst_18 : f32 to vector<1x32xf32>
    %41 = arith.mulf %37, %40 : vector<1x32xf32>
    %42 = arith.mulf %39, %39 : vector<1x32xf32>
    %43 = arith.subf %41, %42 : vector<1x32xf32>
    %44 = vector.broadcast %39 : vector<1x32xf32> to vector<8x32xf32>
    %45 = arith.subf %32, %44 : vector<8x32xf32>
    %cst_19 = arith.constant 9.99999974E-6 : f32
    %46 = vector.broadcast %cst_19 : f32 to vector<1x32xf32>
    %47 = arith.addf %43, %46 : vector<1x32xf32>
    %48 = math.rsqrt %47 : vector<1x32xf32>
    %49 = vector.broadcast %48 : vector<1x32xf32> to vector<8x32xf32>
    %50 = arith.mulf %45, %49 : vector<8x32xf32>
    %cst_20 = arith.constant dense<0.000000e+00> : vector<8x16xf32>
    %51 = tpu.matmul %50, %3, %cst_20 {dimension_numbers = #tpu.dot_dimension_numbers<[1], [0], [0], [1], [0, 0, 1, 1], [], []>} : vector<8x32xf32>, vector<32x16xf32>, vector<8x16xf32> -> vector<8x16xf32>
    %52 = vector.broadcast %4 : vector<1x16xf32> to vector<8x16xf32>
    %53 = arith.addf %51, %52 : vector<8x16xf32>
    %cst_21 = arith.constant 0.000000e+00 : f32
    %54 = vector.broadcast %cst_21 : f32 to vector<8x16xf32>
    %55 = arith.cmpf oge, %53, %54 : vector<8x16xf32>
    %cst_22 = arith.constant 0.00999999977 : f32
    %56 = vector.broadcast %cst_22 : f32 to vector<8x16xf32>
    %57 = arith.mulf %56, %53 : vector<8x16xf32>
    %58 = arith.select %55, %53, %57 : vector<8x16xi1>, vector<8x16xf32>
    %cst_23 = arith.constant dense<0.000000e+00> : vector<16xf32>
    %59 = vector.multi_reduction <add>, %58, %cst_23 [0] : vector<8x16xf32> to vector<16xf32>
    %60 = vector.shape_cast %59 : vector<16xf32> to vector<1x16xf32>
    %61 = arith.mulf %58, %58 : vector<8x16xf32>
    %cst_24 = arith.constant dense<0.000000e+00> : vector<16xf32>
    %62 = vector.multi_reduction <add>, %61, %cst_24 [0] : vector<8x16xf32> to vector<16xf32>
    %63 = vector.shape_cast %62 : vector<16xf32> to vector<1x16xf32>
    %cst_25 = arith.constant 1.250000e-01 : f32
    %64 = vector.broadcast %cst_25 : f32 to vector<1x16xf32>
    %65 = arith.mulf %60, %64 : vector<1x16xf32>
    %cst_26 = arith.constant 1.250000e-01 : f32
    %66 = vector.broadcast %cst_26 : f32 to vector<1x16xf32>
    %67 = arith.mulf %63, %66 : vector<1x16xf32>
    %68 = arith.mulf %65, %65 : vector<1x16xf32>
    %69 = arith.subf %67, %68 : vector<1x16xf32>
    %70 = vector.broadcast %65 : vector<1x16xf32> to vector<8x16xf32>
    %71 = arith.subf %58, %70 : vector<8x16xf32>
    %cst_27 = arith.constant 9.99999974E-6 : f32
    %72 = vector.broadcast %cst_27 : f32 to vector<1x16xf32>
    %73 = arith.addf %69, %72 : vector<1x16xf32>
    %74 = math.rsqrt %73 : vector<1x16xf32>
    %75 = vector.broadcast %74 : vector<1x16xf32> to vector<8x16xf32>
    %76 = arith.mulf %71, %75 : vector<8x16xf32>
    %77 = vector.broadcast %5 : vector<1x16xf32> to vector<8x16xf32>
    %78 = arith.mulf %76, %77 : vector<8x16xf32>
    %cst_28 = arith.constant dense<0.000000e+00> : vector<8xf32>
    %79 = vector.multi_reduction <add>, %78, %cst_28 [1] : vector<8x16xf32> to vector<8xf32>
    %80 = vector.shape_cast %79 : vector<8xf32> to vector<8x1xf32>
    %81 = vector.broadcast %6 : vector<1x1xf32> to vector<8x1xf32>
    %82 = arith.addf %80, %81 : vector<8x1xf32>
    %cst_29 = arith.constant 0.000000e+00 : f32
    %83 = vector.broadcast %cst_29 : f32 to vector<8x128xf32>
    %c0_30 = arith.constant 0 : index
    %c0_31 = arith.constant 0 : index
    %84 = vector.load %arg2[%c0_30, %c0_31] : memref<8x128xf32, #tpu.memory_space<vmem>>, vector<8x128xf32>
    tpu.vector_store %arg2[%c0_30, %c0_31], %83 {strides = array<i32>} : memref<8x128xf32, #tpu.memory_space<vmem>>, vector<8x128xf32>,
    %c0_32 = arith.constant 0 : index
    %c0_33 = arith.constant 0 : index
    %85 = vector.load %arg2[%c0_32, %c0_33] : memref<8x128xf32, #tpu.memory_space<vmem>>, vector<8x16xf32>
    tpu.vector_store %arg2[%c0_32, %c0_33], %58 {strides = array<i32>} : memref<8x128xf32, #tpu.memory_space<vmem>>, vector<8x16xf32>,
    %c0_34 = arith.constant 0 : index
    %c16_35 = arith.constant 16 : index
    %86 = vector.load %arg2[%c0_34, %c16_35] : memref<8x128xf32, #tpu.memory_space<vmem>>, vector<8x1xf32>
    tpu.vector_store %arg2[%c0_34, %c16_35], %82 {strides = array<i32>} : memref<8x128xf32, #tpu.memory_space<vmem>>, vector<8x1xf32>,
    return
  }
}

</mosaic_0001>

<bundles_post_ra>
// kernel: tpu_custom_call.1
= control target key start
LH: loop header
LB: loop body
LE: loop exit
PB: predicated region body
PF: predicated region fallthrough
CT: control target
= control target key end

     0   :  { %7 = vsyncpa [#allocation3], 0  ;;  %s477_s0 = inlined_call_operand.hbm [shape: f32[8,15], index: 0, kind: input, shape index: {}]   ;;  %s478_s1 = inlined_call_operand.hbm [shape: f32[80,128], index: 1, kind: input, shape index: {}]   ;;  %s479_s2 = inlined_call_operand.hbm [shape: f32[8,128], index: 2, kind: output, shape index: {}]  }
   0x1   :  { %8 = vsyncpa [#allocation6], 0 }
   0x2   :  { %9 = vsyncpa [#allocation4], 0  ;;  %s435_s9 = smov [#allocation2]   ;;  %s436_s11 = smov [#allocation5]  }
   0x3   :  { %s16_s10 = sshll.u32 %s435_s9, 4  ;;  %s25_s12 = sshll.u32 %s436_s11, 4  ;;  %s17_s10 = int_to_ptr.vmem [resolvable:$true] %s16_s10  ;;  %s26_s12 = int_to_ptr.vmem [resolvable:$true] %s25_s12 }
   0x4   :  { %s377_s13 = scalar_lea.vmem %s17_s10, 128  ;;  %p382_p1 = scmp.lt.s32.totalorder %s17_s10, %s17_s10 }
   0x5   :  { %p378_p0 = scmp.ne.s32.totalorder %s17_s10, %s377_s13  ;;  %p383_p2 = scmp.lt.s32.totalorder %s377_s13, %s377_s13 }
   0x7   :  { %p384_p3 = por %p383_p2, %p382_p1 }
   0x9   :  { %p385_p4 = pnand %p384_p3, %p378_p0 }
   0xb   :  { %388 = shalt.err (!%p385_p4)
}
   0xc   :  { %19 = dma.hbm_to_vmem [thread:$0]  %s477_s0, 128, %s17_s10, [#allocation3]  }
   0xd   :  { %s397_s16 = scalar_lea.vmem %s26_s12, 1280  ;;  %p402_p6 = scmp.lt.s32.totalorder %s26_s12, %s26_s12 }
   0xe   :  { %p398_p5 = scmp.ne.s32.totalorder %s26_s12, %s397_s16  ;;  %p403_p7 = scmp.lt.s32.totalorder %s397_s16, %s397_s16 }
  0x10   :  { %p404_p8 = por %p403_p7, %p402_p6 }
  0x12   :  { %p405_p9 = pnand %p404_p8, %p398_p5 }
  0x14   :  { %408 = shalt.err (!%p405_p9)
}
  0x15   :  { %s437_s17 = smov 128   ;;  %s438_s18 = smov 8  }
  0x16   :  { %31 = dma.hbm_to_vmem [thread:$0]  %s478_s1, 1280, %s26_s12, [#allocation6], %s437_s17, %s437_s17, %s438_s18  }
  0x17   :  { %429 = dma.done.wait [#allocation3], 128  }
  0x18   :  { %430 = vsyncadd [#allocation3], 4294967168 }
  0x19   :  { %431 = dma.done.wait [#allocation6], 1280  }
  0x1a   :  { %432 = vsyncadd [#allocation6], 4294966016  ;;  %v439_v0 = vmov 0.0   ;;  %vm440_vm0 = vmmov 0   ;;  %vm80_vm1 = vcmask 1046528   ;;  %vm49_vm2 = vcmask 121856  }
  0x1b   :  { %337 = vmatprep.subr.mxu0 %v439_v0  ;;  %298 = vst [vmem:[#allocation7] sm:$0xff] %v439_v0  ;;  %341 = vmatprep.mubr.msk.f32.mxu0 %vm440_vm0, %v439_v0  ;;  %v40_v1 = vld [vmem:[#allocation5 + $0x8] sm:$0x7f]  ;;  %v39_v2 = vld [vmem:[#allocation5] sm:$0xff]  ;;  %v38_v3 = vld [vmem:[#allocation2] sm:$0xff]  ;;  %vm157_vm4 = vcmask 261120  }
  0x1c   :  { %344 = vmatprep.subr.mxu1 %v439_v0  ;;  %352 = vmatprep.mubr.msk.f32.mxu1 %vm440_vm0, %v439_v0  ;;  %v50_v4 = vsel %vm49_vm2, %v38_v3, 0.0  ;;  %v57_v5 = vmul.f32 %v38_v3, %v38_v3  ;;  %v45_v27 = vld [vmem:[#allocation5 + $0x30] sm:$0xff]  ;;  %v44_v28 = vld [vmem:[#allocation5 + $0x28] sm:$0xff]  ;;  %v43_v29 = vld [vmem:[#allocation5 + $0x20] sm:$0xff]  ;;  %vm261_vm6 = vcmask 130048   ;;  %s441_s0 = smov 16  }
  0x1d   :  { %338 = vmatpush3.msk.msra.mxu0 %vm80_vm1, %v40_v1  ;;  %v51_v6 = vrot.slane %v50_v4, 4  ;;  %345 = vmatpush3.msra.mxu1 %v45_v27  ;;  %v42_v30 = vld [vmem:[#allocation5 + $0x18] sm:$0xff]  ;;  %v322_v31 = vld [vmem:[#allocation5 + $0x10] ss:$0 sm:$0xff]  ;;  %s442_s1 = smov [#allocation7]   ;;  %vm304_vm7 = vcmask 138368  }
  0x1e   :  { %339 = vmatprep.subr.mxu0 %v439_v0  ;;  %v58_v7 = vsel %vm49_vm2, %v57_v5, 0.0  ;;  %346 = vmatprep.subr.mxu1 %v439_v0  ;;  %v325_v60 = vld [vmem:[#allocation5 + $0x38] ss:$0 sm:$0xff]  ;;  %s312_s21 = sshll.u32 %s442_s1, 4  ;;  %s313_s21 = int_to_ptr.vmem [resolvable:$true] %s312_s21 }
  0x1f   :  { %340 = vmatpush3.msra.mxu0 %v39_v2  ;;  %v52_v8 = vadd.f32 %v51_v6, %v50_v4  ;;  %v59_v9 = vrot.slane %v58_v7, 4  ;;  %347 = vmatpush3.msra.mxu1 %v44_v28  ;;  %v328_v28 = vld [vmem:[#allocation5 + $0x48] ss:$0 sm:$0xff]  ;;  %s409_s22 = scalar_lea.vmem %s313_s21, 128  ;;  %p414_p11 = scmp.lt.s32.totalorder %s313_s21, %s313_s21 }
  0x20   :  { %348 = vmatprep.subr.mxu1 %v439_v0  ;;  %p410_p10 = scmp.ne.s32.totalorder %s313_s21, %s409_s22  ;;  %p415_p12 = scmp.lt.s32.totalorder %s409_s22, %s409_s22 }
  0x21   :  { %v53_v10 = vrot.slane %v52_v8, 2  ;;  %v60_v11 = vadd.f32 %v59_v9, %v58_v7  ;;  %349 = vmatpush3.msra.mxu1 %v43_v29 }
  0x22   :  { %350 = vmatprep.subr.mxu1 %v439_v0  ;;  %p416_p13 = por %p415_p12, %p414_p11 }
  0x23   :  { %v54_v12 = vadd.f32 %v53_v10, %v52_v8  ;;  %v61_v13 = vrot.slane %v60_v11, 2  ;;  %351 = vmatpush3.msra.mxu1 %v42_v30 }
  0x24   :  { %p417_p0 = pnand %p416_p13, %p410_p10 }
  0x25   :  { %v55_v14 = vrot.slane %v54_v12, 1  ;;  %v62_v15 = vadd.f32 %v61_v13, %v60_v11 }
  0x27   :  { %v56_v16 = vadd.f32 %v55_v14, %v54_v12  ;;  %v63_v17 = vrot.slane %v62_v15, 1 }
  0x29   :  { %v64_v18 = vadd.f32 %v63_v17, %v62_v15  ;;  %v65_v19 = vmul.f32 0.125, %v56_v16 }
  0x2b   :  { %v66_v20 = vmul.f32 0.125, %v64_v18  ;;  %v67_v21 = vmul.f32 %v65_v19, %v65_v19  ;;  %v69_v24 = vsub.f32 %v38_v3, %v65_v19 }
  0x2d   :  { %v68_v22 = vsub.f32 %v66_v20, %v67_v21 }
  0x2f   :  { %v70_v23 = vadd.f32 1e-05, %v68_v22 }
  0x31   :  { %363 = vrsqrt.f32 %v70_v23 }
  0x3e   :  { %v364_v25 = vpop.eup %363 }
  0x3f   :  { %v72_v26 = vmul.f32 %v364_v25, %v69_v24  ;;  %v327_v24 = vld [vmem:[#allocation5 + $0x40] ss:$0 sm:$0xff] }
  0x41   :  { %342 = vmatmul.mubr.msk.f32.vlgmr.msra.gmra.mxu0 %vm49_vm2, %v72_v26 }
 0x101   :  { %v150_v32 = vpop.f32.mrf.mxu0 }
 0x102   :  { %v151_v33 = vadd.f32 %v322_v31, %v150_v32 }
 0x103   :  { %v343_v34 = vpop.f32.mrf.mxu0 }
 0x104   :  { %vm154_vm3 = vcmp.ge.f32.partialorder %v151_v33, 0.0  ;;  %v155_v35 = vmul.f32 0.01, %v151_v33 }
 0x106   :  { %v156_v36 = vsel %vm154_vm3, %v151_v33, %v155_v35 }
 0x107   :  { %v165_v37 = vmul.f32 %v156_v36, %v156_v36  ;;  %v158_v38 = vsel %vm157_vm4, %v156_v36, 0.0 }
 0x108   :  { %v159_v39 = vrot.slane %v158_v38, 4 }
 0x109   :  { %v166_v40 = vsel %vm157_vm4, %v165_v37, 0.0 }
 0x10a   :  { %v160_v41 = vadd.f32 %v159_v39, %v158_v38  ;;  %v167_v42 = vrot.slane %v166_v40, 4 }
 0x10c   :  { %v161_v43 = vrot.slane %v160_v41, 2  ;;  %v168_v44 = vadd.f32 %v167_v42, %v166_v40 }
 0x10e   :  { %v162_v45 = vadd.f32 %v161_v43, %v160_v41  ;;  %v169_v46 = vrot.slane %v168_v44, 2 }
 0x110   :  { %v163_v47 = vrot.slane %v162_v45, 1  ;;  %v170_v48 = vadd.f32 %v169_v46, %v168_v44 }
 0x112   :  { %v164_v49 = vadd.f32 %v163_v47, %v162_v45  ;;  %v171_v50 = vrot.slane %v170_v48, 1 }
 0x114   :  { %v172_v51 = vadd.f32 %v171_v50, %v170_v48  ;;  %v173_v52 = vmul.f32 0.125, %v164_v49 }
 0x116   :  { %v174_v53 = vmul.f32 0.125, %v172_v51  ;;  %v175_v54 = vmul.f32 %v173_v52, %v173_v52  ;;  %v177_v57 = vsub.f32 %v156_v36, %v173_v52 }
 0x118   :  { %v176_v55 = vsub.f32 %v174_v53, %v175_v54 }
 0x11a   :  { %v178_v56 = vadd.f32 1e-05, %v176_v55 }
 0x11c   :  { %365 = vrsqrt.f32 %v178_v56 }
 0x129   :  { %v366_v58 = vpop.eup %365 }
 0x12a   :  { %v180_v59 = vmul.f32 %v366_v58, %v177_v57 }
 0x12c   :  { %353 = vmatmul.mubr.msk.f32.vlgmr.msra.gmra.mxu1 %vm157_vm4, %v180_v59 }
 0x1ec   :  { %v254_v61 = vpop.f32.mrf.mxu1 }
 0x1ed   :  { %v255_v62 = vadd.f32 %v325_v60, %v254_v61 }
 0x1ee   :  { %v354_v63 = vpop.f32.mrf.mxu1 }
 0x1ef   :  { %vm258_vm5 = vcmp.ge.f32.partialorder %v255_v62, 0.0  ;;  %v259_v0 = vmul.f32 0.01, %v255_v62 }
 0x1f1   :  { %v260_v1 = vsel %vm258_vm5, %v255_v62, %v259_v0 }
 0x1f2   :  { %v269_v2 = vmul.f32 %v260_v1, %v260_v1  ;;  %v262_v3 = vsel %vm261_vm6, %v260_v1, 0.0  ;;  %299 = vst.msk [vmem:[#allocation7] sm:$0xff] %vm261_vm6, %v260_v1 }
 0x1f3   :  { %v263_v4 = vrot.slane %v262_v3, 4 }
 0x1f4   :  { %v270_v5 = vsel %vm261_vm6, %v269_v2, 0.0 }
 0x1f5   :  { %v264_v6 = vadd.f32 %v263_v4, %v262_v3  ;;  %v271_v7 = vrot.slane %v270_v5, 4 }
 0x1f7   :  { %v265_v8 = vrot.slane %v264_v6, 2  ;;  %v272_v9 = vadd.f32 %v271_v7, %v270_v5 }
 0x1f9   :  { %v266_v10 = vadd.f32 %v265_v8, %v264_v6  ;;  %v273_v11 = vrot.slane %v272_v9, 2 }
 0x1fb   :  { %v267_v12 = vrot.slane %v266_v10, 1  ;;  %v274_v13 = vadd.f32 %v273_v11, %v272_v9 }
 0x1fd   :  { %v268_v14 = vadd.f32 %v267_v12, %v266_v10  ;;  %v275_v15 = vrot.slane %v274_v13, 1 }
 0x1ff   :  { %v276_v16 = vadd.f32 %v275_v15, %v274_v13  ;;  %v277_v17 = vmul.f32 0.125, %v268_v14 }
 0x201   :  { %v278_v18 = vmul.f32 0.125, %v276_v16  ;;  %v279_v19 = vmul.f32 %v277_v17, %v277_v17  ;;  %v281_v22 = vsub.f32 %v260_v1, %v277_v17 }
 0x203   :  { %v280_v20 = vsub.f32 %v278_v18, %v279_v19 }
 0x205   :  { %v282_v21 = vadd.f32 1e-05, %v280_v20 }
 0x207   :  { %367 = vrsqrt.f32 %v282_v21 }
 0x214   :  { %v368_v23 = vpop.eup %367 }
 0x215   :  { %v284_v25 = vmul.f32 %v368_v23, %v281_v22 }
 0x217   :  { %v289_v26 = vmul.f32 %v327_v24, %v284_v25 }
 0x219   :  { %v290_v27 = vsel %vm261_vm6, %v289_v26, 0.0 }
 0x21a   :  { %291 = vadd.xlane.f32.xlu0 %v290_v27 }
 0x2a3   :  { %v292_v29 = vpop.xlane.xlu0 %291 }
 0x2a4   :  { %v297_v30 = vadd.f32 %v328_v28, %v292_v29 }
 0x2a6   :  { %301 = vrot.lane.b32.xlu0 %v297_v30, %s441_s0 }
 0x318   :  { %v302_v31 = vpop.permute.xlu0 %301 }
 0x319   :  { %305 = vst.msk [vmem:[#allocation7] sm:$0xff] %vm304_vm7, %v302_v31 }
 0x31a   :  { %420 = shalt.err (!%p417_p0)
}
 0x31b   :  { %315 = dma.vmem_to_hbm [thread:$0]  %s313_s21, 128, %s479_s2, [#allocation4]  }
 0x31c   :  { %433 = dma.done.wait [#allocation4], 128  }
 0x31d   :  { %434 = vsyncadd [#allocation4], 4294967168 }
 0x31e   :  { %319 = vsyncpa [#allocation3], 1 }
 0x31f   :  { %320 = vsyncpa [#allocation6], 1 }
 0x320   :  { %321 = vsyncpa [#allocation4], 1 }

</bundles_post_ra>
